<compile_context>
chip_gen: v7x
topology: tpu7x:2x2x1
jax: 0.10.0
libtpu: 0.0.40
codegen_flags: <defaults>
</compile_context>

<pallas_src>
import math

import jax
import jax.numpy as jnp
from jax.experimental import pallas as pl
from jax.experimental.pallas import tpu as pltpu


def _ls_ce_kernel(x_ref, t_ref, m_ref, o_ref):
    """x_ref, t_ref: (TM, V); m_ref: (TM, Vm) with Vm in {1, V}; o_ref: (2, V)."""
    step = pl.program_id(0)

    @pl.when(step == 0)
    def _init():
        o_ref[...] = jnp.zeros_like(o_ref)

    x = x_ref[...].astype(jnp.float32)
    t = t_ref[...].astype(jnp.float32)
    m = m_ref[...].astype(jnp.float32)

    # Numerically stable log_softmax along the lane (class) axis.
    row_max = jnp.max(x, axis=-1, keepdims=True)
    shifted = x - row_max
    lse = jnp.log(jnp.sum(jnp.exp(shifted), axis=-1, keepdims=True))
    logprobs = shifted - lse

    term = (-logprobs) * t * m                          # (TM, V); 0 exactly where masked

    # Per-lane partial sum / nonzero count, accumulated in the resident output.
    o_ref[0:1, :] += jnp.sum(term, axis=0, keepdims=True)
    o_ref[1:2, :] += jnp.sum((term != 0.0).astype(jnp.float32),
                             axis=0, keepdims=True)


def label_smoothing_cross_entropy(x, smoothed_target, mask):
    """x, smoothed_target: (..., V); mask: per-position (...,) / (..., 1) or full (..., V)."""
    assert x.shape == smoothed_target.shape
    lead, V = x.shape[:-1], x.shape[-1]
    N = math.prod(lead) if lead else 1

    x2 = x.reshape(N, V)
    t2 = smoothed_target.reshape(N, V)

    mask = jnp.asarray(mask, dtype=jnp.float32)
    if mask.shape == x.shape:
        m2 = mask.reshape(N, V)                          # full element-wise mask
    else:
        if mask.ndim == x.ndim and mask.shape[-1] == 1:
            mask = jnp.squeeze(mask, axis=-1)
        m2 = jnp.broadcast_to(mask, lead).reshape(N, 1)  # per-position mask
    Vm = m2.shape[-1]

    # Row-tile size: multiple of 8, bounded so the double-buffered working set
    # (x + target + mask tiles, 2 buffers each) stays around ~8 MiB of VMEM.
    bytes_per_row = 4 * (2 * V + Vm)
    tm = (4 * 1024 * 1024) // max(bytes_per_row, 1)
    tm = max(8, min(512, (tm // 8) * 8))
    tm = min(tm, -(-N // 8) * 8)                         # don't over-pad tiny inputs
    n_pad = -(-N // tm) * tm

    if n_pad != N:
        pad = n_pad - N
        # Padded rows have target == 0 and mask == 0 -> contribute nothing to
        # either the partial sum or the nonzero count.
        x2 = jnp.pad(x2, ((0, pad), (0, 0)))
        t2 = jnp.pad(t2, ((0, pad), (0, 0)))
        m2 = jnp.pad(m2, ((0, pad), (0, 0)))

    grid = (n_pad // tm,)

    cost = pl.CostEstimate(
        flops=8 * n_pad * V,                             # max/sub/mul/reduce adds
        transcendentals=n_pad * V + n_pad,               # exp per element + log per row
        bytes_accessed=4 * (2 * n_pad * V + n_pad * Vm) + 8 * V,
    )

    partials = pl.pallas_call(
        _ls_ce_kernel,
        out_shape=jax.ShapeDtypeStruct((2, V), jnp.float32),
        grid_spec=pltpu.PrefetchScalarGridSpec(
            num_scalar_prefetch=0,
            grid=grid,
            in_specs=[
                pl.BlockSpec((tm, V), lambda i: (i, 0)),
                pl.BlockSpec((tm, V), lambda i: (i, 0)),
                pl.BlockSpec((tm, Vm), lambda i: (i, 0)),
            ],
            out_specs=pl.BlockSpec((2, V), lambda i: (0, 0)),
        ),
        compiler_params=pltpu.CompilerParams(
            dimension_semantics=("arbitrary",),          # grid axis carries accumulation
        ),
        cost_estimate=cost,
    )(x2, t2, m2)

    # Final tiny reduction + scalar divide outside the kernel.
    # count == 0 -> NaN, matching torch's mean over an empty selection.
    return jnp.sum(partials[0]) / jnp.sum(partials[1])


def _reference(x, target, mask):
    x = x.astype(jnp.float32)
    target = target.astype(jnp.float32)
    mask = jnp.asarray(mask, dtype=jnp.float32)
    logprobs = jax.nn.log_softmax(x, axis=-1)
    if mask.shape == x.shape:
        m = mask
    else:
        if mask.ndim == x.ndim and mask.shape[-1] == 1:
            mask = jnp.squeeze(mask, axis=-1)
        m = jnp.broadcast_to(mask, x.shape[:-1])[..., None]
    loss = -logprobs * target * m
    nz = (loss != 0.0).astype(jnp.float32)
    return jnp.sum(loss) / jnp.sum(nz)


if __name__ == "__main__":
    key = jax.random.PRNGKey(0)
    kx, kl = jax.random.split(key)

    B, T, V = 2, 8, 128
    x = jax.random.normal(kx, (B, T, V), dtype=jnp.float32)

    labels = jax.random.randint(kl, (B, T), 0, V)
    eps = 0.1
    smoothed_target = (jax.nn.one_hot(labels, V, dtype=jnp.float32) * (1.0 - eps)
                       + eps / V)

    lengths = jnp.array([T, 5])
    mask = (jnp.arange(T)[None, :] < lengths[:, None]).astype(jnp.float32)  # (B, T)

    loss = label_smoothing_cross_entropy(x, smoothed_target, mask)
    loss = jax.block_until_ready(loss)

    ref = _reference(x, smoothed_target, mask)
    assert loss.shape == ()
    assert jnp.allclose(loss, ref, atol=1e-5, rtol=1e-5), (loss, ref)

    print("KERNEL_OK")
</pallas_src>

<mosaic_0001>
module attributes {stable_mosaic.version = 11 : i64} {
  func.func @_ls_ce_kernel(%arg0: i32, %arg1: memref<16x128xf32, #tpu.memory_space<vmem>>, %arg2: memref<16x128xf32, #tpu.memory_space<vmem>>, %arg3: memref<16x1xf32, #tpu.memory_space<vmem>>, %arg4: memref<2x128xf32, #tpu.memory_space<vmem>>) attributes {dimension_semantics = [#tpu.dimension_semantics<arbitrary>], iteration_bounds = array<i64: 1>, scalar_prefetch = 0 : i64, scratch_operands = 0 : i64, tpu.core_type = #tpu.core_type<tc>, window_params = [{transform_indices = @transform_0, window_bounds = array<i64: 16, 128>}, {transform_indices = @transform_1, window_bounds = array<i64: 16, 128>}, {transform_indices = @transform_2, window_bounds = array<i64: 16, 1>}, {pipeline_mode = #tpu.pipeline_mode<synchronous>, transform_indices = @transform_3, window_bounds = array<i64: 2, 128>}]} {
    %c0_i32 = arith.constant 0 : i32
    %0 = arith.cmpi eq, %arg0, %c0_i32 : i32
    %1 = arith.extui %0 : i1 to i32
    %c0_i32_0 = arith.constant 0 : i32
    %2 = arith.cmpi ne, %1, %c0_i32_0 : i32
    scf.if %2 {
      %cst_18 = arith.constant 0.000000e+00 : f32
      %35 = vector.broadcast %cst_18 : f32 to vector<2x128xf32>
      %c0_19 = arith.constant 0 : index
      %c0_20 = arith.constant 0 : index
      %36 = vector.load %arg4[%c0_19, %c0_20] : memref<2x128xf32, #tpu.memory_space<vmem>>, vector<2x128xf32>
      tpu.vector_store %arg4[%c0_19, %c0_20], %35 {strides = array<i32>} : memref<2x128xf32, #tpu.memory_space<vmem>>, vector<2x128xf32>,
    } else {
    }
    %c0 = arith.constant 0 : index
    %c0_1 = arith.constant 0 : index
    %3 = vector.load %arg1[%c0, %c0_1] : memref<16x128xf32, #tpu.memory_space<vmem>>, vector<16x128xf32>
    %c0_2 = arith.constant 0 : index
    %c0_3 = arith.constant 0 : index
    %4 = vector.load %arg2[%c0_2, %c0_3] : memref<16x128xf32, #tpu.memory_space<vmem>>, vector<16x128xf32>
    %c0_4 = arith.constant 0 : index
    %c0_5 = arith.constant 0 : index
    %5 = vector.load %arg3[%c0_4, %c0_5] : memref<16x1xf32, #tpu.memory_space<vmem>>, vector<16x1xf32>
    %cst = arith.constant dense<0xFF800000> : vector<16xf32>
    %6 = vector.multi_reduction <maximumf>, %3, %cst [1] : vector<16x128xf32> to vector<16xf32>
    %7 = vector.shape_cast %6 : vector<16xf32> to vector<16x1xf32>
    %8 = vector.broadcast %7 : vector<16x1xf32> to vector<16x128xf32>
    %9 = arith.subf %3, %8 : vector<16x128xf32>
    %10 = math.exp %9 : vector<16x128xf32>
    %cst_6 = arith.constant dense<0.000000e+00> : vector<16xf32>
    %11 = vector.multi_reduction <add>, %10, %cst_6 [1] : vector<16x128xf32> to vector<16xf32>
    %12 = vector.shape_cast %11 : vector<16xf32> to vector<16x1xf32>
    %13 = math.log %12 : vector<16x1xf32>
    %14 = vector.broadcast %13 : vector<16x1xf32> to vector<16x128xf32>
    %15 = arith.subf %9, %14 : vector<16x128xf32>
    %cst_7 = arith.constant 0.000000e+00 : f32
    %16 = vector.broadcast %cst_7 : f32 to vector<16x128xf32>
    %17 = arith.subf %16, %15 : vector<16x128xf32>
    %18 = arith.mulf %17, %4 : vector<16x128xf32>
    %19 = vector.broadcast %5 : vector<16x1xf32> to vector<16x128xf32>
    %20 = arith.mulf %18, %19 : vector<16x128xf32>
    %c0_8 = arith.constant 0 : index
    %c0_9 = arith.constant 0 : index
    %21 = vector.load %arg4[%c0_8, %c0_9] : memref<2x128xf32, #tpu.memory_space<vmem>>, vector<1x128xf32>
    %cst_10 = arith.constant dense<0.000000e+00> : vector<128xf32>
    %22 = vector.multi_reduction <add>, %20, %cst_10 [0] : vector<16x128xf32> to vector<128xf32>
    %23 = vector.shape_cast %22 : vector<128xf32> to vector<1x128xf32>
    %24 = arith.addf %21, %23 : vector<1x128xf32>
    %c0_11 = arith.constant 0 : index
    %c0_12 = arith.constant 0 : index
    %25 = vector.load %arg4[%c0_11, %c0_12] : memref<2x128xf32, #tpu.memory_space<vmem>>, vector<1x128xf32>
    tpu.vector_store %arg4[%c0_11, %c0_12], %24 {strides = array<i32>} : memref<2x128xf32, #tpu.memory_space<vmem>>, vector<1x128xf32>,
    %c1 = arith.constant 1 : index
    %c0_13 = arith.constant 0 : index
    %26 = vector.load %arg4[%c1, %c0_13] : memref<2x128xf32, #tpu.memory_space<vmem>>, vector<1x128xf32>
    %cst_14 = arith.constant 0.000000e+00 : f32
    %27 = vector.broadcast %cst_14 : f32 to vector<16x128xf32>
    %28 = arith.cmpf one, %20, %27 : vector<16x128xf32>
    %29 = arith.extui %28 : vector<16x128xi1> to vector<16x128xi32>
    %30 = arith.sitofp %29 : vector<16x128xi32> to vector<16x128xf32>
    %cst_15 = arith.constant dense<0.000000e+00> : vector<128xf32>
    %31 = vector.multi_reduction <add>, %30, %cst_15 [0] : vector<16x128xf32> to vector<128xf32>
    %32 = vector.shape_cast %31 : vector<128xf32> to vector<1x128xf32>
    %33 = arith.addf %26, %32 : vector<1x128xf32>
    %c1_16 = arith.constant 1 : index
    %c0_17 = arith.constant 0 : index
    %34 = vector.load %arg4[%c1_16, %c0_17] : memref<2x128xf32, #tpu.memory_space<vmem>>, vector<1x128xf32>
    tpu.vector_store %arg4[%c1_16, %c0_17], %33 {strides = array<i32>} : memref<2x128xf32, #tpu.memory_space<vmem>>, vector<1x128xf32>,
    return
  }
  func.func @transform_0(%arg0: i32) -> (i32, i32) {
    %c0_i32 = arith.constant 0 : i32
    %c0_i32_0 = arith.constant 0 : i32
    return %arg0, %c0_i32 : i32, i32
  }
  func.func @transform_1(%arg0: i32) -> (i32, i32) {
    %c0_i32 = arith.constant 0 : i32
    %c0_i32_0 = arith.constant 0 : i32
    return %arg0, %c0_i32 : i32, i32
  }
  func.func @transform_2(%arg0: i32) -> (i32, i32) {
    %c0_i32 = arith.constant 0 : i32
    %c0_i32_0 = arith.constant 0 : i32
    return %arg0, %c0_i32 : i32, i32
  }
  func.func @transform_3(%arg0: i32) -> (i32, i32) {
    %c0_i32 = arith.constant 0 : i32
    %c0_i32_0 = arith.constant 0 : i32
    %c0_i32_1 = arith.constant 0 : i32
    return %c0_i32, %c0_i32_0 : i32, i32
  }
}

</mosaic_0001>

<bundles_post_ra>
// kernel: tpu_custom_call.1
= control target key start
LH: loop header
LB: loop body
LE: loop exit
PB: predicated region body
PF: predicated region fallthrough
CT: control target
= control target key end

     0   :  { %8 = vsyncpa [#allocation3], 0  ;;  %s245_s0 = inlined_call_operand.vmem [shape: f32[16,128], index: 0, kind: input, shape index: {}]   ;;  %s246_s1 = inlined_call_operand.hbm [shape: f32[16,128], index: 1, kind: input, shape index: {}]   ;;  %s247_s2 = inlined_call_operand.vmem [shape: f32[16,1], index: 2, kind: input, shape index: {}]   ;;  %s248_s3 = inlined_call_operand.hbm [shape: f32[2,128], index: 3, kind: output, shape index: {}]  }
   0x1   :  { %9 = vsyncpa [#allocation4], 0  ;;  %s183_s12 = smov [#allocation2]   ;;  %s135_s16 = scalar_lea.hbm %s246_s1, 256 }
   0x2   :  { %s17_s13 = sshll.u32 %s183_s12, 4  ;;  %p136_p0 = scmp.ne.s32.totalorder %s246_s1, %s135_s16  ;;  %s18_s13 = int_to_ptr.vmem [resolvable:$true] %s17_s13 }
   0x3   :  { %p139_p1 = scmp.lt.u32.totalorder %s135_s16, %s246_s1 }
   0x5   :  { %p141_p2 = pnand %p139_p1, %p136_p0 }
   0x7   :  { %144 = shalt.err (!%p141_p2)
}
   0x8   :  { %s145_s21 = scalar_lea.vmem %s18_s13, 256  ;;  %p150_p4 = scmp.lt.s32.totalorder %s18_s13, %s18_s13 }
   0x9   :  { %p146_p3 = scmp.ne.s32.totalorder %s18_s13, %s145_s21  ;;  %p151_p5 = scmp.lt.s32.totalorder %s145_s21, %s145_s21 }
   0xb   :  { %p152_p6 = por %p151_p5, %p150_p4 }
   0xd   :  { %p153_p7 = pnand %p152_p6, %p146_p3 }
   0xf   :  { %156 = shalt.err (!%p153_p7)
}
  0x10   :  { %s184_s22 = smov 128   ;;  %s185_s23 = smov 8  }
  0x11   :  { %23 = dma.hbm_to_vmem [thread:$0]  %s246_s1, 256, %s18_s13, [#allocation3], %s184_s22, %s184_s22, %s185_s23  }
  0x12   :  { %179 = dma.done.wait [#allocation3], 256  }
  0x13   :  { %180 = vsyncadd [#allocation3], 4294967040  ;;  %v34_v0 = vld [vmem:[%s245_s0] sm:$0xff]  ;;  %v35_v1 = vld [vmem:[%s245_s0 + $0x8] sm:$0xff]  ;;  %v186_v3 = vmov 0   ;;  %v187_v13 = vmov 0.0  }
  0x14   :  { %40 = vmax.xlane.f32.xlu0 %v34_v0  ;;  %v38_v2 = vld [vmem:[%s247_s2] sm:$0xff]  ;;  %126 = vset.pattern.permute.xlu1 %v186_v3  ;;  %v39_v12 = vld [vmem:[%s247_s2 + $0x8] sm:$0xff]  ;;  %33 = vst [vmem:[#allocation5] sm:$0x3] %v187_v13  ;;  %s188_s2 = smov [#allocation5]  }
  0x15   :  { %125 = vset.pattern.permute.xlu0 %v186_v3  ;;  %v36_v20 = vld [vmem:[#allocation2] sm:$0xff]  ;;  %v37_v26 = vld [vmem:[#allocation2 + $0x8] sm:$0xff]  ;;  %s108_s5 = sshll.u32 %s188_s2, 4  ;;  %s109_s5 = int_to_ptr.vmem [resolvable:$true] %s108_s5 }
  0x16   :  { %s157_s6 = scalar_lea.vmem %s109_s5, 32  ;;  %p162_p9 = scmp.lt.s32.totalorder %s109_s5, %s109_s5 }
  0x17   :  { %p158_p8 = scmp.ne.s32.totalorder %s109_s5, %s157_s6  ;;  %p163_p10 = scmp.lt.s32.totalorder %s157_s6, %s157_s6 }
  0x18   :  { %42 = vmax.xlane.f32.xlu0 %v35_v1 }
  0x19   :  { %p164_p11 = por %p163_p10, %p162_p9 }
  0x1b   :  { %v76_v45 = vld [vmem:[#allocation5] sm:$0x1]  ;;  %v86_v48 = vld [vmem:[#allocation5 + $0x1] sm:$0x1]  ;;  %p165_p12 = pnand %p164_p11, %p158_p8 }
  0x2e   :  { %66 = vperm.xlu0 %125, %v38_v2  }
  0xa1   :  { %v41_v4 = vpop.xlane.xlu0 %40 }
  0xa2   :  { %v44_v5 = vsub.f32 %v34_v0, %v41_v4 }
  0xa4   :  { %v46_v6 = vmul.f32 1.442695, %v44_v5 }
  0xa5   :  { %v43_v7 = vpop.xlane.xlu0 %42 }
  0xa6   :  { %v45_v8 = vsub.f32 %v35_v1, %v43_v7  ;;  %127 = vpow2.f32 %v46_v6 }
  0xa8   :  { %v48_v9 = vmul.f32 1.442695, %v45_v8 }
  0xaa   :  { %129 = vpow2.f32 %v48_v9 }
  0xad   :  { %v67_v23 = vpop.permute.xlu0 %66 }
  0xb0   :  { %v128_v10 = vpop.eup %127 }
  0xb1   :  { %50 = vadd.xlane.f32.xlu1 %v128_v10 }
  0xb4   :  { %v130_v11 = vpop.eup %129 }
  0xb5   :  { %52 = vadd.xlane.f32.xlu1 %v130_v11 }
  0xc6   :  { %71 = vperm.xlu1 %126, %v39_v12  }
 0x13e   :  { %v51_v14 = vpop.xlane.xlu1 %50 }
 0x13f   :  { %131 = vlog2.f32 %v51_v14 }
 0x142   :  { %v53_v15 = vpop.xlane.xlu1 %52 }
 0x143   :  { %133 = vlog2.f32 %v53_v15 }
 0x146   :  { %v72_v29 = vpop.permute.xlu1 %71 }
 0x149   :  { %v132_v16 = vpop.eup %131 }
 0x14a   :  { %v55_v17 = vmul.f32 0.6931472, %v132_v16 }
 0x14c   :  { %v58_v18 = vsub.f32 %v44_v5, %v55_v17 }
 0x14d   :  { %v134_v19 = vpop.eup %133 }
 0x14e   :  { %v57_v21 = vmul.f32 0.6931472, %v134_v19  ;;  %v60_v22 = vsub.f32 0.0, %v58_v18 }
 0x150   :  { %v62_v24 = vmul.f32 %v60_v22, %v36_v20  ;;  %v59_v25 = vsub.f32 %v45_v8, %v57_v21 }
 0x152   :  { %v74_v27 = vmul.f32 %v67_v23, %v62_v24  ;;  %v61_v28 = vsub.f32 0.0, %v59_v25 }
 0x154   :  { %v63_v30 = vmul.f32 %v61_v28, %v37_v26  ;;  %vm87_vm0 = vcmp.ne.f32.partialorder %v74_v27, 0.0 }
 0x155   :  { %v117_v33 = vsel %vm87_vm0, 1.0, %v187_v13 }
 0x156   :  { %v75_v31 = vmul.f32 %v72_v29, %v63_v30 }
 0x158   :  { %v77_v32 = vadd.f32 %v75_v31, %v74_v27  ;;  %vm88_vm1 = vcmp.ne.f32.partialorder %v75_v31, 0.0 }
 0x159   :  { %v118_v34 = vsel %vm88_vm1, 1.0, %v187_v13 }
 0x15a   :  { %v78_v35 = vrot.slane %v77_v32, 4  ;;  %v93_v36 = vadd.f32 %v118_v34, %v117_v33 }
 0x15c   :  { %v79_v37 = vadd.f32 %v78_v35, %v77_v32  ;;  %v94_v38 = vrot.slane %v93_v36, 4 }
 0x15e   :  { %v80_v39 = vrot.slane %v79_v37, 2  ;;  %v95_v40 = vadd.f32 %v94_v38, %v93_v36 }
 0x160   :  { %v81_v41 = vadd.f32 %v80_v39, %v79_v37  ;;  %v96_v42 = vrot.slane %v95_v40, 2 }
 0x162   :  { %v82_v43 = vrot.slane %v81_v41, 1  ;;  %v97_v44 = vadd.f32 %v96_v42, %v95_v40 }
 0x164   :  { %v83_v46 = vadd.f32 %v82_v43, %v81_v41  ;;  %v98_v47 = vrot.slane %v97_v44, 1 }
 0x166   :  { %v84_v49 = vadd.f32 %v83_v46, %v76_v45  ;;  %v99_v50 = vadd.f32 %v98_v47, %v97_v44 }
 0x168   :  { %85 = vst [vmem:[#allocation5] sm:$0x1] %v84_v49  ;;  %v100_v51 = vadd.f32 %v99_v50, %v86_v48 }
 0x16a   :  { %101 = vst [vmem:[#allocation5 + $0x1] sm:$0x1] %v100_v51 }
 0x16b   :  { %168 = shalt.err (!%p165_p12)
}
 0x16c   :  { %s169_s9 = scalar_lea.hbm %s248_s3, 32 }
 0x16d   :  { %p170_p13 = scmp.ne.s32.totalorder %s248_s3, %s169_s9  ;;  %p173_p0 = scmp.lt.u32.totalorder %s169_s9, %s248_s3 }
 0x16f   :  { %p175_p1 = pnand %p173_p0, %p170_p13 }
 0x171   :  { %178 = shalt.err (!%p175_p1)
}
 0x172   :  { %111 = dma.vmem_to_hbm [thread:$0]  %s109_s5, 32, %s248_s3, [#allocation4]  }
 0x173   :  { %181 = dma.done.wait [#allocation4], 32  }
 0x174   :  { %182 = vsyncadd [#allocation4], 4294967264 }
 0x175   :  { %115 = vsyncpa [#allocation3], 1 }
 0x176   :  { %116 = vsyncpa [#allocation4], 1 }

</bundles_post_ra>
